<compile_context>
chip_gen: v5e
topology: v5e:2x2
jax: 0.10.0
libtpu: 0.0.40
codegen_flags: <defaults>
</compile_context>

<pallas_src>
import functools

import jax
import jax.numpy as jnp
from jax.experimental import pallas as pl
from jax.experimental.pallas import tpu as pltpu


def cond_inorm_kernel(x_ref, z_ref, wsh_ref, bsh_ref, wsc_ref, bsc_ref,
                      out_ref, *, eps):
    # x_ref  : (N*C, H*W)  one row per (sample, channel) instance
    # z_ref  : (N*C, Zc)   conditioning vector, repeated per channel row
    # wsh_ref: (N*C, Zc)   shift 1x1-conv weight row for that (sample, channel)
    # bsh_ref: (N*C, 1)    shift bias
    # wsc_ref: (N*C, Zc)   scale 1x1-conv weight row
    # bsc_ref: (N*C, 1)    scale bias
    # out_ref: (N*C, H*W)
    x = x_ref[...].astype(jnp.float32)
    hw = x.shape[1]

    # ---- instance norm over the spatial (lane) axis ------------------------
    mean = jnp.mean(x, axis=1, keepdims=True)
    xc = x - mean
    # PyTorch .var() default is unbiased: divide by (HW - 1)
    var = jnp.sum(xc * xc, axis=1, keepdims=True) * (1.0 / (hw - 1))
    inv_std = jax.lax.rsqrt(var + eps)
    norm = xc * inv_std

    # ---- conditional shift / scale: 1x1 conv on z (+bias) + ReLU -----------
    # per-row: shift[r] = relu(sum_k z[n(r),k] * W_shift[c(r),k] + b_shift[c(r)])
    z = z_ref[...].astype(jnp.float32)
    shift = jnp.maximum(
        jnp.sum(z * wsh_ref[...], axis=1, keepdims=True) + bsh_ref[...], 0.0)
    scale = jnp.maximum(
        jnp.sum(z * wsc_ref[...], axis=1, keepdims=True) + bsc_ref[...], 0.0)

    out_ref[...] = (norm * scale + shift).astype(out_ref.dtype)


def cond_inorm_pallas(x, z, w_shift, b_shift, w_scale, b_scale, *, eps=1e-5):
    """x: (N, C, H, W); z: (N, Zc, 1, 1);
    w_shift / w_scale: (C, Zc, 1, 1) (nn.Conv2d 1x1 weights);
    b_shift / b_scale: (C,). Returns (N, C, H, W)."""
    N, C, H, W = x.shape
    Zc = z.shape[1]
    assert z.shape[2] == 1 and z.shape[3] == 1
    # TODO(synk): spatially-varying z (Hz == H, Wz == W broadcast) not implemented;
    # the module's usual conditioning case (z spatial 1x1) is what this covers.

    HW = H * W
    # Free reshapes (no transpose): lane-dense (N*C, H*W) slabs in/out.
    x2d = x.reshape(N * C, HW)
    # Tiny per-row expansions (a few dozen floats) of z / weights / biases.
    z_rows = jnp.repeat(z.reshape(N, Zc), C, axis=0)          # (N*C, Zc)
    wsh_rows = jnp.tile(w_shift.reshape(C, Zc), (N, 1))        # (N*C, Zc)
    wsc_rows = jnp.tile(w_scale.reshape(C, Zc), (N, 1))        # (N*C, Zc)
    bsh_col = jnp.tile(b_shift.reshape(C, 1), (N, 1))          # (N*C, 1)
    bsc_col = jnp.tile(b_scale.reshape(C, 1), (N, 1))          # (N*C, 1)

    kernel = functools.partial(cond_inorm_kernel, eps=eps)
    vmem = pltpu.MemorySpace.VMEM

    out2d = pl.pallas_call(
        kernel,
        out_shape=jax.ShapeDtypeStruct((N * C, HW), x.dtype),
        in_specs=[pl.BlockSpec(memory_space=vmem)] * 6,
        out_specs=pl.BlockSpec(memory_space=vmem),
    )(x2d, z_rows, wsh_rows, bsh_col, wsc_rows, bsc_col)

    return out2d.reshape(N, C, H, W)


def cond_inorm_reference(x, z, w_shift, b_shift, w_scale, b_scale, *, eps=1e-5):
    """Plain-JAX reference matching the PyTorch forward (NCHW)."""
    N, C, H, W = x.shape

    def conv1x1(v, w, b):
        out = jax.lax.conv_general_dilated(
            v, w, window_strides=(1, 1), padding=[(0, 0), (0, 0)],
            dimension_numbers=('NCHW', 'OIHW', 'NCHW'))
        return out + b.reshape(1, -1, 1, 1)

    shift = jax.nn.relu(conv1x1(z, w_shift, b_shift))
    scale = jax.nn.relu(conv1x1(z, w_scale, b_scale))

    xr = x.reshape(N, C, H * W)
    mean = jnp.mean(xr, axis=2, keepdims=True)
    var = jnp.var(xr, axis=2, keepdims=True, ddof=1)   # torch .var() is unbiased
    std = jax.lax.rsqrt(var + eps)
    norm = ((xr - mean) * std).reshape(N, C, H, W)
    return norm * scale + shift


if __name__ == "__main__":
    key = jax.random.PRNGKey(0)
    N, C, ZC, H, W = 2, 4, 8, 16, 16

    kx, kz, k1, k2, k3, k4 = jax.random.split(key, 6)
    x = jax.random.normal(kx, (N, C, H, W), dtype=jnp.float32)
    z = jax.random.normal(kz, (N, ZC, 1, 1), dtype=jnp.float32)
    # deterministic synthetic Conv2d(1x1, bias=True) parameters
    w_shift = jax.random.normal(k1, (C, ZC, 1, 1), dtype=jnp.float32) * 0.3
    b_shift = jax.random.normal(k2, (C,), dtype=jnp.float32) * 0.1
    w_scale = jax.random.normal(k3, (C, ZC, 1, 1), dtype=jnp.float32) * 0.3
    b_scale = jax.random.normal(k4, (C,), dtype=jnp.float32) * 0.1

    out = cond_inorm_pallas(x, z, w_shift, b_shift, w_scale, b_scale)
    out = jax.block_until_ready(out)

    ref = jax.block_until_ready(
        cond_inorm_reference(x, z, w_shift, b_shift, w_scale, b_scale))
    err = float(jnp.max(jnp.abs(out - ref)))
    assert out.shape == (N, C, H, W), out.shape
    assert err < 1e-4, f"max abs error {err}"

    print("KERNEL_OK")
</pallas_src>

<mosaic_0001>
module attributes {stable_mosaic.version = 11 : i64} {
  func.func @cond_inorm_kernel(%arg0: memref<8x256xf32, #tpu.memory_space<vmem>>, %arg1: memref<8x8xf32, #tpu.memory_space<vmem>>, %arg2: memref<8x8xf32, #tpu.memory_space<vmem>>, %arg3: memref<8x1xf32, #tpu.memory_space<vmem>>, %arg4: memref<8x8xf32, #tpu.memory_space<vmem>>, %arg5: memref<8x1xf32, #tpu.memory_space<vmem>>, %arg6: memref<8x256xf32, #tpu.memory_space<vmem>>) attributes {dimension_semantics = [], scalar_prefetch = 0 : i64, scratch_operands = 0 : i64, tpu.core_type = #tpu.core_type<tc>} {
    %c0 = arith.constant 0 : index
    %c0_0 = arith.constant 0 : index
    %0 = vector.load %arg0[%c0, %c0_0] : memref<8x256xf32, #tpu.memory_space<vmem>>, vector<8x256xf32>
    %cst = arith.constant dense<0.000000e+00> : vector<8xf32>
    %1 = vector.multi_reduction <add>, %0, %cst [1] : vector<8x256xf32> to vector<8xf32>
    %2 = vector.shape_cast %1 : vector<8xf32> to vector<8x1xf32>
    %cst_1 = arith.constant 2.560000e+02 : f32
    %3 = vector.broadcast %cst_1 : f32 to vector<8x1xf32>
    %4 = arith.divf %2, %3 : vector<8x1xf32>
    %5 = vector.broadcast %4 : vector<8x1xf32> to vector<8x256xf32>
    %6 = arith.subf %0, %5 : vector<8x256xf32>
    %7 = arith.mulf %6, %6 : vector<8x256xf32>
    %cst_2 = arith.constant dense<0.000000e+00> : vector<8xf32>
    %8 = vector.multi_reduction <add>, %7, %cst_2 [1] : vector<8x256xf32> to vector<8xf32>
    %9 = vector.shape_cast %8 : vector<8xf32> to vector<8x1xf32>
    %cst_3 = arith.constant 0.00392156886 : f32
    %10 = vector.broadcast %cst_3 : f32 to vector<8x1xf32>
    %11 = arith.mulf %9, %10 : vector<8x1xf32>
    %cst_4 = arith.constant 9.99999974E-6 : f32
    %12 = vector.broadcast %cst_4 : f32 to vector<8x1xf32>
    %13 = arith.addf %11, %12 : vector<8x1xf32>
    %14 = math.rsqrt %13 : vector<8x1xf32>
    %15 = vector.broadcast %14 : vector<8x1xf32> to vector<8x256xf32>
    %16 = arith.mulf %6, %15 : vector<8x256xf32>
    %c0_5 = arith.constant 0 : index
    %c0_6 = arith.constant 0 : index
    %17 = vector.load %arg1[%c0_5, %c0_6] : memref<8x8xf32, #tpu.memory_space<vmem>>, vector<8x8xf32>
    %c0_7 = arith.constant 0 : index
    %c0_8 = arith.constant 0 : index
    %18 = vector.load %arg2[%c0_7, %c0_8] : memref<8x8xf32, #tpu.memory_space<vmem>>, vector<8x8xf32>
    %19 = arith.mulf %17, %18 : vector<8x8xf32>
    %cst_9 = arith.constant dense<0.000000e+00> : vector<8xf32>
    %20 = vector.multi_reduction <add>, %19, %cst_9 [1] : vector<8x8xf32> to vector<8xf32>
    %21 = vector.shape_cast %20 : vector<8xf32> to vector<8x1xf32>
    %c0_10 = arith.constant 0 : index
    %c0_11 = arith.constant 0 : index
    %22 = vector.load %arg3[%c0_10, %c0_11] : memref<8x1xf32, #tpu.memory_space<vmem>>, vector<8x1xf32>
    %23 = arith.addf %21, %22 : vector<8x1xf32>
    %cst_12 = arith.constant 0.000000e+00 : f32
    %24 = vector.broadcast %cst_12 : f32 to vector<8x1xf32>
    %25 = arith.maximumf %23, %24 : vector<8x1xf32>
    %c0_13 = arith.constant 0 : index
    %c0_14 = arith.constant 0 : index
    %26 = vector.load %arg4[%c0_13, %c0_14] : memref<8x8xf32, #tpu.memory_space<vmem>>, vector<8x8xf32>
    %27 = arith.mulf %17, %26 : vector<8x8xf32>
    %cst_15 = arith.constant dense<0.000000e+00> : vector<8xf32>
    %28 = vector.multi_reduction <add>, %27, %cst_15 [1] : vector<8x8xf32> to vector<8xf32>
    %29 = vector.shape_cast %28 : vector<8xf32> to vector<8x1xf32>
    %c0_16 = arith.constant 0 : index
    %c0_17 = arith.constant 0 : index
    %30 = vector.load %arg5[%c0_16, %c0_17] : memref<8x1xf32, #tpu.memory_space<vmem>>, vector<8x1xf32>
    %31 = arith.addf %29, %30 : vector<8x1xf32>
    %cst_18 = arith.constant 0.000000e+00 : f32
    %32 = vector.broadcast %cst_18 : f32 to vector<8x1xf32>
    %33 = arith.maximumf %31, %32 : vector<8x1xf32>
    %34 = vector.broadcast %33 : vector<8x1xf32> to vector<8x256xf32>
    %35 = arith.mulf %16, %34 : vector<8x256xf32>
    %36 = vector.broadcast %25 : vector<8x1xf32> to vector<8x256xf32>
    %37 = arith.addf %35, %36 : vector<8x256xf32>
    %c0_19 = arith.constant 0 : index
    %c0_20 = arith.constant 0 : index
    %38 = vector.load %arg6[%c0_19, %c0_20] : memref<8x256xf32, #tpu.memory_space<vmem>>, vector<8x256xf32>
    tpu.vector_store %arg6[%c0_19, %c0_20], %37 {strides = array<i32>} : memref<8x256xf32, #tpu.memory_space<vmem>>, vector<8x256xf32>,
    return
  }
}

</mosaic_0001>

<bundles_post_ra>
// kernel: tpu_custom_call.1
= control target key start
LH: loop header
LB: loop body
LE: loop exit
PB: predicated region body
PF: predicated region fallthrough
CT: control target
= control target key end

     0   :  { %11 = vsyncpa [#allocation3], 0  ;;  %s330_s0 = inlined_call_operand.vmem [shape: f32[8,256], index: 0, kind: input, shape index: {}]   ;;  %s331_s1 = inlined_call_operand.hbm [shape: f32[8,8], index: 1, kind: input, shape index: {}]   ;;  %s332_s2 = inlined_call_operand.hbm [shape: f32[8,8], index: 2, kind: input, shape index: {}]   ;;  %s333_s3 = inlined_call_operand.vmem [shape: f32[8,1], index: 3, kind: input, shape index: {}]   ;;  %s334_s4 = inlined_call_operand.hbm [shape: f32[8,8], index: 4, kind: input, shape index: {}]   ;;  %s335_s5 = inlined_call_operand.vmem [shape: f32[8,1], index: 5, kind: input, shape index: {}]   ;;  %s336_s6 = inlined_call_operand.hbm [shape: f32[8,256], index: 6, kind: output, shape index: {}]  }
   0x1   :  { %12 = vsyncpa [#allocation6], 0  ;;  %s32_s23 = sshll.u32 %s332_s2, 4  ;;  %s33_s23 = int_to_ptr.hbm [resolvable:$true] %s32_s23 }
   0x2   :  { %13 = vsyncpa [#allocation4], 0  ;;  %s265_s24 = smov [#allocation5]   ;;  %s21_s28 = sshll.u32 %s331_s1, 4  ;;  %s22_s28 = int_to_ptr.hbm [resolvable:$true] %s21_s28 }
   0x3   :  { %s34_s25 = sshll.u32 %s265_s24, 4  ;;  %s266_s29 = smov [#allocation2]   ;;  %s35_s25 = int_to_ptr.vmem [resolvable:$true] %s34_s25 }
   0x4   :  { %37 = dma.hbm_to_vmem [thread:$0]  %s33_s23, 128, %s35_s25, [#allocation6]  }
   0x5   :  { %s23_s30 = sshll.u32 %s266_s29, 4  ;;  %s45_s9 = sshll.u32 %s334_s4, 4  ;;  %s24_s30 = int_to_ptr.vmem [resolvable:$true] %s23_s30  ;;  %s46_s9 = int_to_ptr.hbm [resolvable:$true] %s45_s9 }
   0x6   :  { %26 = dma.hbm_to_vmem [thread:$0]  %s22_s28, 128, %s24_s30, [#allocation3]  }
   0x7   :  { %s267_s2 = smov [#allocation7]  }
   0x8   :  { %s47_s10 = sshll.u32 %s267_s2, 4  ;;  %s48_s10 = int_to_ptr.vmem [resolvable:$true] %s47_s10 }
   0x9   :  { %50 = dma.hbm_to_vmem [thread:$0]  %s46_s9, 128, %s48_s10, [#allocation6]  }
   0xa   :  { %259 = dma.done.wait [#allocation3], 128  }
   0xb   :  { %260 = vsyncadd [#allocation3], 4294967168 }
   0xc   :  { %261 = dma.done.wait [#allocation6], 256  }
   0xd   :  { %262 = vsyncadd [#allocation6], 4294967040  ;;  %v65_v0 = vld [vmem:[%s330_s0] sm:$0xff]  ;;  %v66_v1 = vld [vmem:[%s330_s0 + $0x8] sm:$0xff]  ;;  %vm102_vm0 = vcmask 64512   ;;  %v268_v10 = vmov 256.0  }
   0xe   :  { %v67_v2 = vadd.f32 %v66_v1, %v65_v0  ;;  %v99_v3 = vld [vmem:[#allocation2] sm:$0xff]  ;;  %v109_v4 = vld [vmem:[#allocation7] sm:$0xff]  ;;  %v100_v5 = vld [vmem:[#allocation5] sm:$0xff]  ;;  %159 = vrcp.f32 %v268_v10  ;;  %v269_v12 = vmov 0   ;;  %s140_s18 = sshll.u32 %s336_s6, 4  ;;  %s141_s18 = int_to_ptr.hbm [resolvable:$true] %s140_s18 }
   0xf   :  { %v101_v6 = vmul.f32 %v100_v5, %v99_v3  ;;  %v110_v7 = vmul.f32 %v109_v4, %v99_v3  ;;  %157 = vset.pattern.permute.xlu2 %v269_v12  ;;  %158 = vset.pattern.permute.xlu0 %v269_v12  ;;  %v114_v24 = vld [vmem:[%s335_s5] sm:$0xff] }
  0x10   :  { %68 = vadd.xlane.f32.xlu0 %v67_v2  ;;  %v106_v28 = vld [vmem:[%s333_s3] sm:$0xff]  ;;  %s270_s3 = smov [#allocation8]  }
  0x11   :  { %v103_v8 = vsel %vm102_vm0, %v101_v6, 0.0  ;;  %v111_v9 = vsel %vm102_vm0, %v110_v7, 0.0  ;;  %s138_s5 = sshll.u32 %s270_s3, 4  ;;  %s139_s5 = int_to_ptr.vmem [resolvable:$true] %s138_s5 }
  0x12   :  { %104 = vadd.xlane.f32.xlu1 %v103_v8 }
  0x14   :  { %v160_v11 = vpop.eup %159 }
  0x15   :  { %v71_v13 = vmul.f32 256.0, %v160_v11  ;;  %vm75_vm1 = vweird.f32 %v160_v11 }
  0x17   :  { %v72_v14 = vsub.f32 1.0, %v71_v13 }
  0x18   :  { %112 = vadd.xlane.f32.xlu0 %v111_v9 }
  0x19   :  { %v73_v15 = vmul.f32 %v160_v11, %v72_v14 }
  0x1b   :  { %v74_v16 = vadd.f32 %v160_v11, %v73_v15 }
  0x1d   :  { %v76_v17 = vsel %vm75_vm1, %v160_v11, %v74_v16 }
  0x83   :  { %v69_v18 = vpop.xlane.xlu0 %68 }
  0x84   :  { %v77_v19 = vmul.f32 %v76_v17, %v69_v18 }
  0x85   :  { %v105_v29 = vpop.xlane.xlu1 %104 }
  0x86   :  { %v78_v20 = vsub.f32 %v65_v0, %v77_v19  ;;  %v79_v21 = vsub.f32 %v66_v1, %v77_v19  ;;  %v107_v31 = vadd.f32 %v106_v28, %v105_v29 }
  0x88   :  { %v80_v22 = vmul.f32 %v78_v20, %v78_v20  ;;  %v81_v23 = vmul.f32 %v79_v21, %v79_v21  ;;  %v108_v32 = vmax.f32 %v107_v31, 0.0 }
  0x8a   :  { %v82_v25 = vadd.f32 %v81_v23, %v80_v22 }
  0x8b   :  { %v113_v26 = vpop.xlane.xlu0 %112 }
  0x8c   :  { %83 = vadd.xlane.f32.xlu1 %v82_v25  ;;  %v115_v27 = vadd.f32 %v114_v24, %v113_v26 }
  0x8e   :  { %v116_v30 = vmax.f32 %v115_v27, 0.0 }
  0x90   :  { %119 = vperm.xlu2 %157, %v116_v30  }
  0x98   :  { %126 = vperm.xlu2 %157, %v108_v32  }
  0xea   :  { %v120_v40 = vpop.permute.xlu2 %119 }
  0xf2   :  { %v127_v48 = vpop.permute.xlu2 %126 }
  0xff   :  { %v84_v33 = vpop.xlane.xlu1 %83 }
 0x100   :  { %v85_v34 = vmul.f32 0.003921569, %v84_v33 }
 0x102   :  { %v86_v35 = vadd.f32 1e-05, %v85_v34 }
 0x104   :  { %161 = vrsqrt.f32 %v86_v35  ;;  %vm93_vm3 = vweird.f32 %v86_v35 }
 0x10a   :  { %v162_v36 = vpop.eup %161 }
 0x10b   :  { %v88_v37 = vmul.f32 %v162_v36, %v86_v35  ;;  %vm94_vm2 = vweird.f32 %v162_v36 }
 0x10c   :  { %vm95_vm4 = vmor %vm93_vm3, %vm94_vm2 }
 0x10d   :  { %v89_v38 = vmul.f32 %v162_v36, %v88_v37 }
 0x10f   :  { %v90_v39 = vmul.f32 0.5, %v89_v38 }
 0x111   :  { %v91_v41 = vsub.f32 1.5, %v90_v39 }
 0x113   :  { %v92_v42 = vmul.f32 %v162_v36, %v91_v41 }
 0x115   :  { %v96_v43 = vsel %vm95_vm4, %v162_v36, %v92_v42 }
 0x116   :  { %v97_v44 = vmul.f32 %v96_v43, %v78_v20  ;;  %v98_v45 = vmul.f32 %v96_v43, %v79_v21 }
 0x118   :  { %v122_v46 = vmul.f32 %v120_v40, %v97_v44  ;;  %v123_v47 = vmul.f32 %v120_v40, %v98_v45 }
 0x11a   :  { %v129_v49 = vadd.f32 %v127_v48, %v122_v46  ;;  %v130_v50 = vadd.f32 %v127_v48, %v123_v47 }
 0x11c   :  { %131 = vst [vmem:[#allocation8] sm:$0xff] %v129_v49 }
 0x11d   :  { %132 = vst [vmem:[#allocation8 + $0x8] sm:$0xff] %v130_v50 }
 0x11e   :  { %143 = dma.vmem_to_hbm [thread:$0]  %s139_s5, 256, %s141_s18, [#allocation4]  }
 0x11f   :  { %263 = dma.done.wait [#allocation4], 256  }
 0x120   :  { %264 = vsyncadd [#allocation4], 4294967040 }
 0x121   :  { %148 = vsyncpa [#allocation3], 1 }
 0x122   :  { %149 = vsyncpa [#allocation6], 1 }
 0x123   :  { %150 = vsyncpa [#allocation4], 1 }

</bundles_post_ra>
